<compile_context>
chip_gen: v6e
topology: v6e:2x2x1
jax: 0.10.0
libtpu: 0.0.40
codegen_flags: <defaults>
</compile_context>

<pallas_src>
import jax
import jax.numpy as jnp
from jax import lax
from jax.experimental import pallas as pl
from jax.experimental.pallas import tpu as pltpu

IN_DIM = 768
OUT_DIM = 128
EPS = 1e-12  # matches torch.nn.functional.normalize default
DEFAULT_TILE_B = 1024  # 3 MiB x-tile; amortizes per-step overhead, fits VMEM easily


def alignment_kernel(x_ref, w_ref, b_ref, o_ref):
    # Linear: (TILE_B, 768) @ (768, 128) + (1, 128), f32 accumulation on MXU.
    y = jnp.dot(x_ref[...], w_ref[...], preferred_element_type=jnp.float32)
    y = y + b_ref[...]

    # L2 normalize along last dim, fused:
    #   y / max(||y||, eps) == y * rsqrt(max(sum(y*y), eps^2))
    sq = jnp.sum(y * y, axis=-1, keepdims=True)
    inv = lax.rsqrt(jnp.maximum(sq, EPS * EPS))
    o_ref[...] = (y * inv).astype(o_ref.dtype)


def alignment_layer(x, weight_t, bias, tile_b=DEFAULT_TILE_B):
    """x: (B, 768) f32; weight_t: (768, 128) f32 (= W^T); bias: (1, 128) f32."""
    B = x.shape[0]

    # Pick a tile and pad the batch so padded_B % tile == 0 and tile % 8 == 0.
    if B <= tile_b:
        tile = max(8, ((B + 7) // 8) * 8)
        padded_b = tile
    else:
        tile = tile_b
        padded_b = pl.cdiv(B, tile) * tile

    if padded_b != B:
        x = jnp.pad(x, ((0, padded_b - B), (0, 0)))

    grid = (padded_b // tile,)

    out = pl.pallas_call(
        alignment_kernel,
        out_shape=jax.ShapeDtypeStruct((padded_b, OUT_DIM), x.dtype),
        grid_spec=pltpu.PrefetchScalarGridSpec(
            num_scalar_prefetch=0,
            grid=grid,
            in_specs=[
                # x: one batch tile per grid step (auto double-buffered DMA).
                pl.BlockSpec((tile, IN_DIM), lambda i: (i, 0)),
                # weight / bias: constant block index -> stay resident in VMEM.
                pl.BlockSpec((IN_DIM, OUT_DIM), lambda i: (0, 0)),
                pl.BlockSpec((1, OUT_DIM), lambda i: (0, 0)),
            ],
            out_specs=pl.BlockSpec((tile, OUT_DIM), lambda i: (i, 0)),
        ),
        compiler_params=pltpu.CompilerParams(
            dimension_semantics=("parallel",),
        ),
        cost_estimate=pl.CostEstimate(
            flops=2 * padded_b * IN_DIM * OUT_DIM + 4 * padded_b * OUT_DIM,
            transcendentals=padded_b,
            bytes_accessed=4 * (padded_b * IN_DIM + IN_DIM * OUT_DIM
                                + OUT_DIM + padded_b * OUT_DIM),
        ),
    )(x, weight_t, bias)

    return out[:B] if padded_b != B else out


def reference(x, weight_t, bias):
    y = x @ weight_t + bias
    norm = jnp.sqrt(jnp.sum(y * y, axis=-1, keepdims=True))
    return y / jnp.maximum(norm, EPS)


if __name__ == "__main__":
    key = jax.random.PRNGKey(0)
    k_x, k_w, k_b, k_x2 = jax.random.split(key, 4)

    # Deterministic synthetic Linear(768, 128) parameters; stored transposed.
    bound = 1.0 / (IN_DIM ** 0.5)
    weight_t = jax.random.uniform(
        k_w, (IN_DIM, OUT_DIM), dtype=jnp.float32, minval=-bound, maxval=bound
    )
    bias = jax.random.uniform(
        k_b, (1, OUT_DIM), dtype=jnp.float32, minval=-bound, maxval=bound
    )

    # Case 1: sublane-aligned small batch.
    B1 = 8
    x1 = jax.random.normal(k_x, (B1, IN_DIM), dtype=jnp.float32)
    out1 = jax.block_until_ready(alignment_layer(x1, weight_t, bias))
    ref1 = reference(x1, weight_t, bias)
    assert out1.shape == (B1, OUT_DIM)
    assert jnp.allclose(out1, ref1, atol=1e-5, rtol=1e-5), "mismatch (B=8)"

    # Case 2: non-aligned batch exercises the padding path.
    B2 = 10
    x2 = jax.random.normal(k_x2, (B2, IN_DIM), dtype=jnp.float32)
    out2 = jax.block_until_ready(alignment_layer(x2, weight_t, bias))
    ref2 = reference(x2, weight_t, bias)
    assert out2.shape == (B2, OUT_DIM)
    assert jnp.allclose(out2, ref2, atol=1e-5, rtol=1e-5), "mismatch (B=10)"

    print("KERNEL_OK")
</pallas_src>

<mosaic_0001>
module attributes {stable_mosaic.version = 11 : i64} {
  func.func @alignment_kernel(%arg0: i32, %arg1: memref<8x768xf32, #tpu.memory_space<vmem>>, %arg2: memref<768x128xf32, #tpu.memory_space<vmem>>, %arg3: memref<1x128xf32, #tpu.memory_space<vmem>>, %arg4: memref<8x128xf32, #tpu.memory_space<vmem>>) attributes {dimension_semantics = [#tpu.dimension_semantics<parallel>], iteration_bounds = array<i64: 1>, scalar_prefetch = 0 : i64, scratch_operands = 0 : i64, tpu.core_type = #tpu.core_type<tc>, window_params = [{transform_indices = @transform_0, window_bounds = array<i64: 8, 768>}, {pipeline_mode = #tpu.pipeline_mode<synchronous>, transform_indices = @transform_1, window_bounds = array<i64: 768, 128>}, {pipeline_mode = #tpu.pipeline_mode<synchronous>, transform_indices = @transform_2, window_bounds = array<i64: 1, 128>}, {transform_indices = @transform_3, window_bounds = array<i64: 8, 128>}]} {
    %c0 = arith.constant 0 : index
    %c0_0 = arith.constant 0 : index
    %0 = vector.load %arg1[%c0, %c0_0] : memref<8x768xf32, #tpu.memory_space<vmem>>, vector<8x768xf32>
    %c0_1 = arith.constant 0 : index
    %c0_2 = arith.constant 0 : index
    %1 = vector.load %arg2[%c0_1, %c0_2] : memref<768x128xf32, #tpu.memory_space<vmem>>, vector<768x128xf32>
    %cst = arith.constant dense<0.000000e+00> : vector<8x128xf32>
    %2 = tpu.matmul %0, %1, %cst {dimension_numbers = #tpu.dot_dimension_numbers<[1], [0], [0], [1], [0, 0, 1, 1], [], []>} : vector<8x768xf32>, vector<768x128xf32>, vector<8x128xf32> -> vector<8x128xf32>
    %c0_3 = arith.constant 0 : index
    %c0_4 = arith.constant 0 : index
    %3 = vector.load %arg3[%c0_3, %c0_4] : memref<1x128xf32, #tpu.memory_space<vmem>>, vector<1x128xf32>
    %4 = vector.broadcast %3 : vector<1x128xf32> to vector<8x128xf32>
    %5 = arith.addf %2, %4 : vector<8x128xf32>
    %6 = arith.mulf %5, %5 : vector<8x128xf32>
    %cst_5 = arith.constant dense<0.000000e+00> : vector<8xf32>
    %7 = vector.multi_reduction <add>, %6, %cst_5 [1] : vector<8x128xf32> to vector<8xf32>
    %8 = vector.shape_cast %7 : vector<8xf32> to vector<8x1xf32>
    %cst_6 = arith.constant 1.000000e-24 : f32
    %9 = vector.broadcast %cst_6 : f32 to vector<8x1xf32>
    %10 = arith.maximumf %8, %9 : vector<8x1xf32>
    %11 = math.rsqrt %10 : vector<8x1xf32>
    %12 = vector.broadcast %11 : vector<8x1xf32> to vector<8x128xf32>
    %13 = arith.mulf %5, %12 : vector<8x128xf32>
    %c0_7 = arith.constant 0 : index
    %c0_8 = arith.constant 0 : index
    %14 = vector.load %arg4[%c0_7, %c0_8] : memref<8x128xf32, #tpu.memory_space<vmem>>, vector<8x128xf32>
    tpu.vector_store %arg4[%c0_7, %c0_8], %13 {strides = array<i32>} : memref<8x128xf32, #tpu.memory_space<vmem>>, vector<8x128xf32>,
    return
  }
  func.func @transform_0(%arg0: i32) -> (i32, i32) {
    %c0_i32 = arith.constant 0 : i32
    %c0_i32_0 = arith.constant 0 : i32
    return %arg0, %c0_i32 : i32, i32
  }
  func.func @transform_1(%arg0: i32) -> (i32, i32) {
    %c0_i32 = arith.constant 0 : i32
    %c0_i32_0 = arith.constant 0 : i32
    %c0_i32_1 = arith.constant 0 : i32
    return %c0_i32, %c0_i32_0 : i32, i32
  }
  func.func @transform_2(%arg0: i32) -> (i32, i32) {
    %c0_i32 = arith.constant 0 : i32
    %c0_i32_0 = arith.constant 0 : i32
    %c0_i32_1 = arith.constant 0 : i32
    return %c0_i32, %c0_i32_0 : i32, i32
  }
  func.func @transform_3(%arg0: i32) -> (i32, i32) {
    %c0_i32 = arith.constant 0 : i32
    %c0_i32_0 = arith.constant 0 : i32
    return %arg0, %c0_i32 : i32, i32
  }
}

</mosaic_0001>

<bundles_post_ra>
// kernel: tpu_custom_call.1
= control target key start
LH: loop header
LB: loop body
LE: loop exit
PB: predicated region body
PF: predicated region fallthrough
CT: control target
= control target key end

     0   :  { %8 = vsyncpa [#allocation3], 0  ;;  %s599_s0 = inlined_call_operand.hbm [shape: f32[8,768], index: 0, kind: input, shape index: {}]   ;;  %s600_s1 = inlined_call_operand.hbm [shape: f32[768,128], index: 1, kind: input, shape index: {}]   ;;  %s601_s2 = inlined_call_operand.vmem [shape: f32[1,128], index: 2, kind: input, shape index: {}]   ;;  %s602_s3 = inlined_call_operand.hbm [shape: f32[8,128], index: 3, kind: output, shape index: {}]  }
   0x1   :  { %9 = vsyncpa [#allocation6], 0 }
   0x2   :  { %10 = vsyncpa [#allocation4], 0  ;;  %s562_s12 = smov [#allocation2]   ;;  %s563_s14 = smov [#allocation5]  }
   0x3   :  { %s17_s13 = sshll.u32 %s562_s12, 4  ;;  %s26_s15 = sshll.u32 %s563_s14, 4  ;;  %s18_s13 = int_to_ptr.vmem [resolvable:$true] %s17_s13  ;;  %s27_s15 = int_to_ptr.vmem [resolvable:$true] %s26_s15 }
   0x4   :  { %s504_s16 = scalar_lea.vmem %s18_s13, 768  ;;  %p509_p1 = scmp.lt.s32.totalorder %s18_s13, %s18_s13 }
   0x5   :  { %p505_p0 = scmp.ne.s32.totalorder %s18_s13, %s504_s16  ;;  %p510_p2 = scmp.lt.s32.totalorder %s504_s16, %s504_s16 }
   0x7   :  { %p511_p3 = por %p510_p2, %p509_p1 }
   0x9   :  { %p512_p4 = pnand %p511_p3, %p505_p0 }
   0xb   :  { %515 = shalt.err (!%p512_p4)
}
   0xc   :  { %20 = dma.hbm_to_vmem [thread:$0]  %s599_s0, 768, %s18_s13, [#allocation3]  }
   0xd   :  { %s524_s19 = scalar_lea.vmem %s27_s15, 12288  ;;  %p529_p6 = scmp.lt.s32.totalorder %s27_s15, %s27_s15 }
   0xe   :  { %p525_p5 = scmp.ne.s32.totalorder %s27_s15, %s524_s19  ;;  %p530_p7 = scmp.lt.s32.totalorder %s524_s19, %s524_s19 }
  0x10   :  { %p531_p8 = por %p530_p7, %p529_p6 }
  0x12   :  { %p532_p9 = pnand %p531_p8, %p525_p5 }
  0x14   :  { %535 = shalt.err (!%p532_p9)
}
  0x15   :  { %s564_s20 = smov 128   ;;  %s565_s21 = smov 8  }
  0x16   :  { %32 = dma.hbm_to_vmem [thread:$0]  %s600_s1, 12288, %s27_s15, [#allocation6], %s564_s20, %s564_s20, %s565_s21  }
  0x17   :  { %556 = dma.done.wait [#allocation3], 768  }
  0x18   :  { %557 = vsyncadd [#allocation3], 4294966528 }
  0x19   :  { %558 = dma.done.wait [#allocation6], 12288  }
  0x1a   :  { %559 = vsyncadd [#allocation6], 4294955008  ;;  %v78_v0 = vld [vmem:[#allocation5 + $0xf8] sm:$0xff]  ;;  %v77_v2 = vld [vmem:[#allocation5 + $0xf0] sm:$0xff]  ;;  %s566_s24 = smov [#allocation7]  }
  0x1b   :  { %v62_v1 = vld [vmem:[#allocation5 + $0x78] sm:$0xff]  ;;  %384 = vmatprep.subr.mxu0 %v78_v0  ;;  %v61_v4 = vld [vmem:[#allocation5 + $0x70] sm:$0xff]  ;;  %v76_v6 = vld [vmem:[#allocation5 + $0xe8] sm:$0xff]  ;;  %s373_s25 = sshll.u32 %s566_s24, 4  ;;  %s374_s25 = int_to_ptr.vmem [resolvable:$true] %s373_s25 }
  0x1c   :  { %v110_v3 = vld [vmem:[#allocation5 + $0x1f8] sm:$0xff]  ;;  %385 = vmatpush3.msra.mxu0 %v62_v1  ;;  %v109_v7 = vld [vmem:[#allocation5 + $0x1f0] sm:$0xff]  ;;  %v60_v8 = vld [vmem:[#allocation5 + $0x68] sm:$0xff]  ;;  %p541_p11 = scmp.lt.s32.totalorder %s374_s25, %s374_s25 }
  0x1d   :  { %v94_v5 = vld [vmem:[#allocation5 + $0x178] sm:$0xff]  ;;  %419 = vmatprep.subr.mxu1 %v110_v3  ;;  %386 = vmatprep.subr.mxu0 %v77_v2  ;;  %v93_v9 = vld [vmem:[#allocation5 + $0x170] sm:$0xff]  ;;  %v108_v10 = vld [vmem:[#allocation5 + $0x1e8] sm:$0xff] }
  0x1e   :  { %420 = vmatpush3.msra.mxu1 %v94_v5  ;;  %387 = vmatpush3.msra.mxu0 %v61_v4  ;;  %v75_v11 = vld [vmem:[#allocation5 + $0xe0] sm:$0xff]  ;;  %v92_v12 = vld [vmem:[#allocation5 + $0x168] sm:$0xff]  ;;  %v74_v15 = vld [vmem:[#allocation5 + $0xd8] sm:$0xff] }
  0x1f   :  { %421 = vmatprep.subr.mxu1 %v109_v7  ;;  %388 = vmatprep.subr.mxu0 %v76_v6  ;;  %v59_v13 = vld [vmem:[#allocation5 + $0x60] sm:$0xff]  ;;  %v58_v17 = vld [vmem:[#allocation5 + $0x58] sm:$0xff]  ;;  %v73_v19 = vld [vmem:[#allocation5 + $0xd0] sm:$0xff] }
  0x20   :  { %422 = vmatpush3.msra.mxu1 %v93_v9  ;;  %v107_v14 = vld [vmem:[#allocation5 + $0x1e0] sm:$0xff]  ;;  %389 = vmatpush3.msra.mxu0 %v60_v8  ;;  %v106_v18 = vld [vmem:[#allocation5 + $0x1d8] sm:$0xff]  ;;  %v57_v21 = vld [vmem:[#allocation5 + $0x50] sm:$0xff] }
  0x21   :  { %423 = vmatprep.subr.mxu1 %v108_v10  ;;  %v91_v16 = vld [vmem:[#allocation5 + $0x160] sm:$0xff]  ;;  %390 = vmatprep.subr.mxu0 %v75_v11  ;;  %v90_v20 = vld [vmem:[#allocation5 + $0x158] sm:$0xff]  ;;  %v105_v22 = vld [vmem:[#allocation5 + $0x1d0] sm:$0xff] }
  0x22   :  { %424 = vmatpush3.msra.mxu1 %v92_v12  ;;  %391 = vmatpush3.msra.mxu0 %v59_v13  ;;  %v72_v23 = vld [vmem:[#allocation5 + $0xc8] sm:$0xff]  ;;  %v89_v24 = vld [vmem:[#allocation5 + $0x150] sm:$0xff]  ;;  %v71_v27 = vld [vmem:[#allocation5 + $0xc0] sm:$0xff] }
  0x23   :  { %425 = vmatprep.subr.mxu1 %v107_v14  ;;  %392 = vmatprep.subr.mxu0 %v74_v15  ;;  %v56_v25 = vld [vmem:[#allocation5 + $0x48] sm:$0xff]  ;;  %v55_v29 = vld [vmem:[#allocation5 + $0x40] sm:$0xff]  ;;  %v70_v31 = vld [vmem:[#allocation5 + $0xb8] sm:$0xff] }
  0x24   :  { %426 = vmatpush3.msra.mxu1 %v91_v16  ;;  %393 = vmatpush3.msra.mxu0 %v58_v17  ;;  %v104_v26 = vld [vmem:[#allocation5 + $0x1c8] sm:$0xff]  ;;  %v103_v30 = vld [vmem:[#allocation5 + $0x1c0] sm:$0xff]  ;;  %v54_v33 = vld [vmem:[#allocation5 + $0x38] sm:$0xff] }
  0x25   :  { %427 = vmatprep.subr.mxu1 %v106_v18  ;;  %394 = vmatprep.subr.mxu0 %v73_v19  ;;  %v88_v28 = vld [vmem:[#allocation5 + $0x148] sm:$0xff]  ;;  %v87_v32 = vld [vmem:[#allocation5 + $0x140] sm:$0xff]  ;;  %v102_v34 = vld [vmem:[#allocation5 + $0x1b8] sm:$0xff] }
  0x26   :  { %428 = vmatpush3.msra.mxu1 %v90_v20  ;;  %395 = vmatpush3.msra.mxu0 %v57_v21  ;;  %v69_v35 = vld [vmem:[#allocation5 + $0xb0] sm:$0xff]  ;;  %v86_v36 = vld [vmem:[#allocation5 + $0x138] sm:$0xff]  ;;  %v68_v39 = vld [vmem:[#allocation5 + $0xa8] sm:$0xff] }
  0x27   :  { %429 = vmatprep.subr.mxu1 %v105_v22  ;;  %396 = vmatprep.subr.mxu0 %v72_v23  ;;  %v53_v37 = vld [vmem:[#allocation5 + $0x30] sm:$0xff]  ;;  %v52_v41 = vld [vmem:[#allocation5 + $0x28] sm:$0xff]  ;;  %v67_v43 = vld [vmem:[#allocation5 + $0xa0] sm:$0xff] }
  0x28   :  { %430 = vmatpush3.msra.mxu1 %v89_v24  ;;  %397 = vmatpush3.msra.mxu0 %v56_v25  ;;  %v101_v38 = vld [vmem:[#allocation5 + $0x1b0] sm:$0xff]  ;;  %v100_v42 = vld [vmem:[#allocation5 + $0x1a8] sm:$0xff]  ;;  %v51_v45 = vld [vmem:[#allocation5 + $0x20] sm:$0xff] }
  0x29   :  { %431 = vmatprep.subr.mxu1 %v104_v26  ;;  %398 = vmatprep.subr.mxu0 %v71_v27  ;;  %v85_v40 = vld [vmem:[#allocation5 + $0x130] sm:$0xff]  ;;  %v84_v44 = vld [vmem:[#allocation5 + $0x128] sm:$0xff]  ;;  %v99_v46 = vld [vmem:[#allocation5 + $0x1a0] sm:$0xff] }
  0x2a   :  { %432 = vmatpush3.msra.mxu1 %v88_v28  ;;  %399 = vmatpush3.msra.mxu0 %v55_v29  ;;  %v66_v47 = vld [vmem:[#allocation5 + $0x98] sm:$0xff]  ;;  %v83_v48 = vld [vmem:[#allocation5 + $0x120] sm:$0xff]  ;;  %v65_v51 = vld [vmem:[#allocation5 + $0x90] sm:$0xff] }
  0x2b   :  { %433 = vmatprep.subr.mxu1 %v103_v30  ;;  %400 = vmatprep.subr.mxu0 %v70_v31  ;;  %v50_v49 = vld [vmem:[#allocation5 + $0x18] sm:$0xff]  ;;  %v49_v53 = vld [vmem:[#allocation5 + $0x10] sm:$0xff]  ;;  %v64_v55 = vld [vmem:[#allocation5 + $0x88] sm:$0xff] }
  0x2c   :  { %434 = vmatpush3.msra.mxu1 %v87_v32  ;;  %401 = vmatpush3.msra.mxu0 %v54_v33  ;;  %v98_v50 = vld [vmem:[#allocation5 + $0x198] sm:$0xff]  ;;  %v97_v54 = vld [vmem:[#allocation5 + $0x190] sm:$0xff]  ;;  %v48_v57 = vld [vmem:[#allocation5 + $0x8] sm:$0xff] }
  0x2d   :  { %435 = vmatprep.subr.mxu1 %v102_v34  ;;  %402 = vmatprep.subr.mxu0 %v69_v35  ;;  %v82_v52 = vld [vmem:[#allocation5 + $0x118] sm:$0xff]  ;;  %v81_v56 = vld [vmem:[#allocation5 + $0x110] sm:$0xff]  ;;  %v96_v58 = vld [vmem:[#allocation5 + $0x188] sm:$0xff] }
  0x2e   :  { %436 = vmatpush3.msra.mxu1 %v86_v36  ;;  %403 = vmatpush3.msra.mxu0 %v53_v37  ;;  %v63_v59 = vld [vmem:[#allocation5 + $0x80] sm:$0xff]  ;;  %v42_v60 = vld [vmem:[#allocation2 + $0x8] sm:$0xff]  ;;  %v80_v62 = vld [vmem:[#allocation5 + $0x108] sm:$0xff] }
  0x2f   :  { %437 = vmatprep.subr.mxu1 %v101_v38  ;;  %404 = vmatprep.subr.mxu0 %v68_v39  ;;  %v47_v61 = vld [vmem:[#allocation5] sm:$0xff]  ;;  %v41_v63 = vld [vmem:[#allocation2] sm:$0xff]  ;;  %v142_v1 = vld [vmem:[#allocation5 + $0x2f8] sm:$0xff] }
  0x30   :  { %438 = vmatpush3.msra.mxu1 %v85_v40  ;;  %405 = vmatpush3.msra.mxu0 %v52_v41  ;;  %v95_v0 = vld [vmem:[#allocation5 + $0x180] sm:$0xff]  ;;  %v44_v3 = vld [vmem:[#allocation2 + $0x18] sm:$0xff]  ;;  %v126_v4 = vld [vmem:[#allocation5 + $0x278] sm:$0xff] }
  0x31   :  { %439 = vmatprep.subr.mxu1 %v100_v42  ;;  %406 = vmatprep.subr.mxu0 %v67_v43  ;;  %v79_v2 = vld [vmem:[#allocation5 + $0x100] sm:$0xff]  ;;  %v141_v6 = vld [vmem:[#allocation5 + $0x2f0] sm:$0xff]  ;;  %v46_v8 = vld [vmem:[#allocation2 + $0x28] sm:$0xff] }
  0x32   :  { %440 = vmatpush3.msra.mxu1 %v84_v44  ;;  %407 = vmatpush3.msra.mxu0 %v51_v45  ;;  %v43_v5 = vld [vmem:[#allocation2 + $0x10] sm:$0xff]  ;;  %v125_v7 = vld [vmem:[#allocation5 + $0x270] sm:$0xff]  ;;  %v140_v9 = vld [vmem:[#allocation5 + $0x2e8] sm:$0xff] }
  0x33   :  { %441 = vmatprep.subr.mxu1 %v99_v46  ;;  %408 = vmatprep.subr.mxu0 %v66_v47  ;;  %v124_v10 = vld [vmem:[#allocation5 + $0x268] sm:$0xff]  ;;  %v139_v11 = vld [vmem:[#allocation5 + $0x2e0] sm:$0xff]  ;;  %v138_v13 = vld [vmem:[#allocation5 + $0x2d8] sm:$0xff] }
  0x34   :  { %442 = vmatpush3.msra.mxu1 %v83_v48  ;;  %409 = vmatpush3.msra.mxu0 %v50_v49  ;;  %v123_v12 = vld [vmem:[#allocation5 + $0x260] sm:$0xff]  ;;  %v122_v14 = vld [vmem:[#allocation5 + $0x258] sm:$0xff]  ;;  %v137_v15 = vld [vmem:[#allocation5 + $0x2d0] sm:$0xff] }
  0x35   :  { %443 = vmatprep.subr.mxu1 %v98_v50  ;;  %410 = vmatprep.subr.mxu0 %v65_v51  ;;  %v121_v16 = vld [vmem:[#allocation5 + $0x250] sm:$0xff]  ;;  %v136_v17 = vld [vmem:[#allocation5 + $0x2c8] sm:$0xff]  ;;  %v135_v19 = vld [vmem:[#allocation5 + $0x2c0] sm:$0xff] }
  0x36   :  { %444 = vmatpush3.msra.mxu1 %v82_v52  ;;  %411 = vmatpush3.msra.mxu0 %v49_v53  ;;  %v120_v18 = vld [vmem:[#allocation5 + $0x248] sm:$0xff]  ;;  %v119_v20 = vld [vmem:[#allocation5 + $0x240] sm:$0xff]  ;;  %v134_v21 = vld [vmem:[#allocation5 + $0x2b8] sm:$0xff] }
  0x37   :  { %445 = vmatprep.subr.mxu1 %v97_v54  ;;  %412 = vmatprep.subr.mxu0 %v64_v55  ;;  %v118_v22 = vld [vmem:[#allocation5 + $0x238] sm:$0xff]  ;;  %v133_v23 = vld [vmem:[#allocation5 + $0x2b0] sm:$0xff]  ;;  %v132_v25 = vld [vmem:[#allocation5 + $0x2a8] sm:$0xff] }
  0x38   :  { %446 = vmatpush3.msra.mxu1 %v81_v56  ;;  %413 = vmatpush3.msra.mxu0 %v48_v57  ;;  %v117_v24 = vld [vmem:[#allocation5 + $0x230] sm:$0xff]  ;;  %v116_v26 = vld [vmem:[#allocation5 + $0x228] sm:$0xff]  ;;  %v131_v27 = vld [vmem:[#allocation5 + $0x2a0] sm:$0xff] }
  0x39   :  { %447 = vmatprep.subr.mxu1 %v96_v58  ;;  %414 = vmatprep.subr.mxu0 %v63_v59  ;;  %v115_v28 = vld [vmem:[#allocation5 + $0x220] sm:$0xff]  ;;  %v130_v29 = vld [vmem:[#allocation5 + $0x298] sm:$0xff]  ;;  %v129_v31 = vld [vmem:[#allocation5 + $0x290] sm:$0xff] }
  0x3a   :  { %214 = vmatprep.mubr.f32.mxu0 %v42_v60  ;;  %415 = vmatpush3.msra.mxu0 %v47_v61  ;;  %v114_v30 = vld [vmem:[#allocation5 + $0x218] sm:$0xff]  ;;  %v113_v32 = vld [vmem:[#allocation5 + $0x210] sm:$0xff]  ;;  %v128_v33 = vld [vmem:[#allocation5 + $0x288] sm:$0xff] }
  0x3b   :  { %448 = vmatpush3.msra.mxu1 %v80_v62  ;;  %215 = vmatmul.mubr.f32.vlgmr.msra.gmra.mxu0 %v41_v63  ;;  %v112_v34 = vld [vmem:[#allocation5 + $0x208] sm:$0xff]  ;;  %v127_v35 = vld [vmem:[#allocation5 + $0x280] sm:$0xff]  ;;  %v45_v37 = vld [vmem:[#allocation2 + $0x20] sm:$0xff] }
  0x3c   :  { %449 = vmatprep.subr.mxu1 %v95_v0  ;;  %454 = vmatprep.subr.mxu0 %v142_v1  ;;  %v111_v36 = vld [vmem:[#allocation5 + $0x200] sm:$0xff]  ;;  %v383_v42 = vld [vmem:[%s601_s2] ss:$0 sm:$0xff]  ;;  %s536_s2 = scalar_lea.vmem %s374_s25, 128 }
  0x3d   :  { %450 = vmatpush3.msra.mxu1 %v79_v2  ;;  %284 = vmatprep.mubr.f32.mxu1 %v44_v3  ;;  %p537_p10 = scmp.ne.s32.totalorder %s374_s25, %s536_s2  ;;  %p542_p12 = scmp.lt.s32.totalorder %s536_s2, %s536_s2 }
  0x3e   :  { %455 = vmatpush3.msra.mxu0 %v126_v4  ;;  %285 = vmatmul.mubr.f32.vlgmr.msra.gmra.mxu1 %v43_v5 }
  0x3f   :  { %456 = vmatprep.subr.mxu0 %v141_v6  ;;  %354 = vmatprep.mubr.f32.mxu0 %v46_v8  ;;  %p543_p13 = por %p542_p12, %p541_p11 }
  0x40   :  { %457 = vmatpush3.msra.mxu0 %v125_v7 }
  0x41   :  { %458 = vmatprep.subr.mxu0 %v140_v9  ;;  %p544_p0 = pnand %p543_p13, %p537_p10 }
  0x42   :  { %459 = vmatpush3.msra.mxu0 %v124_v10 }
  0x43   :  { %460 = vmatprep.subr.mxu0 %v139_v11 }
  0x44   :  { %461 = vmatpush3.msra.mxu0 %v123_v12 }
  0x45   :  { %462 = vmatprep.subr.mxu0 %v138_v13 }
  0x46   :  { %463 = vmatpush3.msra.mxu0 %v122_v14 }
  0x47   :  { %464 = vmatprep.subr.mxu0 %v137_v15 }
  0x48   :  { %465 = vmatpush3.msra.mxu0 %v121_v16 }
  0x49   :  { %466 = vmatprep.subr.mxu0 %v136_v17 }
  0x4a   :  { %467 = vmatpush3.msra.mxu0 %v120_v18 }
  0x4b   :  { %468 = vmatprep.subr.mxu0 %v135_v19 }
  0x4c   :  { %469 = vmatpush3.msra.mxu0 %v119_v20 }
  0x4d   :  { %470 = vmatprep.subr.mxu0 %v134_v21 }
  0x4e   :  { %471 = vmatpush3.msra.mxu0 %v118_v22 }
  0x4f   :  { %472 = vmatprep.subr.mxu0 %v133_v23 }
  0x50   :  { %473 = vmatpush3.msra.mxu0 %v117_v24 }
  0x51   :  { %474 = vmatprep.subr.mxu0 %v132_v25 }
  0x52   :  { %475 = vmatpush3.msra.mxu0 %v116_v26 }
  0x53   :  { %476 = vmatprep.subr.mxu0 %v131_v27 }
  0x54   :  { %477 = vmatpush3.msra.mxu0 %v115_v28 }
  0x55   :  { %478 = vmatprep.subr.mxu0 %v130_v29 }
  0x56   :  { %479 = vmatpush3.msra.mxu0 %v114_v30 }
  0x57   :  { %480 = vmatprep.subr.mxu0 %v129_v31 }
  0x58   :  { %481 = vmatpush3.msra.mxu0 %v113_v32 }
  0x59   :  { %482 = vmatprep.subr.mxu0 %v128_v33 }
  0x5a   :  { %483 = vmatpush3.msra.mxu0 %v112_v34 }
  0x5b   :  { %484 = vmatprep.subr.mxu0 %v127_v35 }
  0x5c   :  { %485 = vmatpush3.msra.mxu0 %v111_v36 }
  0x5d   :  { %355 = vmatmul.mubr.f32.vlgmr.msra.gmra.mxu0 %v45_v37 }
  0xfb   :  { %v416_v38 = vpop.f32.mrf.mxu0 }
  0xfd   :  { %v417_v39 = vpop.f32.mrf.mxu0 }
  0xfe   :  { %v451_v40 = vpop.f32.mrf.mxu1  ;;  %v418_v41 = vadd.f32 %v417_v39, %v416_v38 }
 0x100   :  { %v452_v43 = vpop.f32.mrf.mxu1  ;;  %v217_v44 = vadd.f32 %v418_v41, %v383_v42 }
 0x101   :  { %v453_v45 = vadd.f32 %v452_v43, %v451_v40 }
 0x103   :  { %v287_v48 = vadd.f32 %v453_v45, %v217_v44 }
 0x11d   :  { %v486_v46 = vpop.f32.mrf.mxu0 }
 0x11f   :  { %v487_v47 = vpop.f32.mrf.mxu0 }
 0x120   :  { %v488_v49 = vadd.f32 %v487_v47, %v486_v46 }
 0x122   :  { %v357_v50 = vadd.f32 %v488_v49, %v287_v48 }
 0x124   :  { %v360_v51 = vmul.f32 %v357_v50, %v357_v50 }
 0x126   :  { %361 = vadd.xlane.f32.xlu0 %v360_v51 }
 0x1af   :  { %v362_v52 = vpop.xlane.xlu0 %361 }
 0x1b0   :  { %v363_v53 = vmax.f32 %v362_v52, 1e-24 }
 0x1b2   :  { %494 = vrsqrt.f32 %v363_v53 }
 0x1bf   :  { %v495_v54 = vpop.eup %494 }
 0x1c0   :  { %v365_v55 = vmul.f32 %v495_v54, %v357_v50 }
 0x1c2   :  { %366 = vst [vmem:[#allocation7] sm:$0xff] %v365_v55 }
 0x1c3   :  { %547 = shalt.err (!%p544_p0)
}
 0x1c4   :  { %376 = dma.vmem_to_hbm [thread:$0]  %s374_s25, 128, %s602_s3, [#allocation4]  }
 0x1c5   :  { %560 = dma.done.wait [#allocation4], 128  }
 0x1c6   :  { %561 = vsyncadd [#allocation4], 4294967168 }
 0x1c7   :  { %380 = vsyncpa [#allocation3], 1 }
 0x1c8   :  { %381 = vsyncpa [#allocation6], 1 }
 0x1c9   :  { %382 = vsyncpa [#allocation4], 1 }

</bundles_post_ra>
